<compile_context>
chip_gen: v7x
topology: tpu7x:2x2x1
jax: 0.10.0
libtpu: 0.0.40
codegen_flags: <defaults>
</compile_context>

<pallas_src>
import functools

import numpy as np
import jax
import jax.numpy as jnp
from jax.experimental import pallas as pl
from jax.experimental.pallas import tpu as pltpu

H_DIM1 = 6
H_DIM2 = 25
H_DIM3 = 8
H_DIM4 = 6
INPUT_DIM = 10
OUTPUT_DIM = 3

# (out_features, in_features) of each Linear, in forward order (PyTorch layout).
_LAYER_DIMS = (
    (H_DIM1, INPUT_DIM),
    (H_DIM2, H_DIM1),
    (H_DIM3, H_DIM2),
    (H_DIM4, H_DIM3),
    (OUTPUT_DIM, H_DIM4),
)


def _round_up(x, m):
    return (x + m - 1) // m * m


# Packed parameter slab: layer i occupies sublane-aligned rows
# [row, row + out_d); columns [0:in_d) hold W (out_d, in_d), column in_d holds b.
_LAYER_SLOTS = []
_row = 0
for _li, (_out_d, _in_d) in enumerate(_LAYER_DIMS):
    _LAYER_SLOTS.append((_row, _out_d, _in_d, _li < len(_LAYER_DIMS) - 1))
    _row += _round_up(_out_d, 8)
SLAB_ROWS = _row                                    # 64
SLAB_COLS = max(d[1] for d in _LAYER_DIMS) + 1      # 26

_FLOPS_PER_ROW = 2 * sum(o * i for o, i in _LAYER_DIMS)   # 2 * 476 MACs per batch row

TILE_B_MAX = 512   # lane-dense batch tile, multiple of 128, VMEM-safe on all gens


def _mlp_kernel(slab_ref, x_ref, o_ref):
    # Feature-major: h is (features, TILE_B); batch on the 128-lane axis.
    h = x_ref[...]                                           # (INPUT_DIM, TILE_B) f32

    for row, out_d, in_d, do_relu in _LAYER_SLOTS:           # statically unrolled
        w = slab_ref[pl.ds(row, out_d), pl.ds(0, in_d)]      # (out_d, in_d)
        b = slab_ref[pl.ds(row, out_d), pl.ds(in_d, 1)]      # (out_d, 1)
        h = jnp.dot(w, h, preferred_element_type=jnp.float32) + b
        if do_relu:
            h = jnp.maximum(h, 0.0)

    # Softmax over the OUTPUT_DIM (=3) feature rows: explicit elementwise
    # max / exp / add over rows (VPU + EUP), exact divide for normalization
    # so each column sums to 1 to f32 rounding.
    rows = [h[i:i + 1, :] for i in range(OUTPUT_DIM)]        # each (1, TILE_B)
    m = rows[0]
    for r in rows[1:]:
        m = jnp.maximum(m, r)
    exps = [jnp.exp(r - m) for r in rows]
    s = exps[0]
    for e in exps[1:]:
        s = s + e
    inv = 1.0 / s                                            # exact reciprocal
    probs = jnp.concatenate([e * inv for e in exps], axis=0)  # (OUTPUT_DIM, TILE_B)
    o_ref[...] = probs.astype(o_ref.dtype)


def pack_params(params):
    """params: list of (w (out,in), b (out,)) -> single (SLAB_ROWS, SLAB_COLS) slab."""
    slab = np.zeros((SLAB_ROWS, SLAB_COLS), np.float32)
    for (row, out_d, in_d, _), (w, b) in zip(_LAYER_SLOTS, params):
        slab[row:row + out_d, :in_d] = np.asarray(w, np.float32)
        slab[row:row + out_d, in_d] = np.asarray(b, np.float32)
    return jnp.asarray(slab)


@functools.partial(jax.jit, static_argnames=("tile_b", "n_tiles"))
def _forward_impl(x, slab, tile_b, n_tiles):
    B = x.shape[0]
    b_pad = n_tiles * tile_b

    # Batch-major -> feature-major, pad the batch (tail tile) with zeros.
    x_t = jnp.pad(x.astype(jnp.float32), ((0, b_pad - B), (0, 0))).T  # (INPUT_DIM, b_pad)

    out_t = pl.pallas_call(
        _mlp_kernel,
        out_shape=jax.ShapeDtypeStruct((OUTPUT_DIM, b_pad), jnp.float32),
        grid_spec=pltpu.PrefetchScalarGridSpec(
            num_scalar_prefetch=0,
            grid=(n_tiles,),
            in_specs=[
                # Packed weights/biases: constant block index => DMA'd once,
                # stays VMEM-resident across all batch tiles.
                pl.BlockSpec((SLAB_ROWS, SLAB_COLS), lambda i: (0, 0)),
                # Batch-tiled, lane-dense input stream.
                pl.BlockSpec((INPUT_DIM, tile_b), lambda i: (0, i)),
            ],
            out_specs=pl.BlockSpec((OUTPUT_DIM, tile_b), lambda i: (0, i)),
        ),
        compiler_params=pltpu.CompilerParams(
            dimension_semantics=("parallel",),        # megacore sharding on v7x
            vmem_limit_bytes=32 * 1024 * 1024,
        ),
        cost_estimate=pl.CostEstimate(
            flops=_FLOPS_PER_ROW * b_pad,
            transcendentals=OUTPUT_DIM * b_pad,                 # 3x exp per row
            bytes_accessed=4 * (INPUT_DIM + OUTPUT_DIM) * b_pad
            + 4 * SLAB_ROWS * SLAB_COLS,
        ),
    )(slab, x_t)

    return out_t.T                                             # (b_pad, OUTPUT_DIM)


def network_forward(x, slab, *, tile_b_max=TILE_B_MAX):
    """x: (B, INPUT_DIM) f32, slab: packed params -> (B, OUTPUT_DIM) softmax probs."""
    assert tile_b_max % 128 == 0
    B = x.shape[0]
    tile_b = min(tile_b_max, _round_up(max(B, 1), 128))
    n_tiles = pl.cdiv(B, tile_b)
    return _forward_impl(x, slab, tile_b, n_tiles)[:B]


def init_params(key):
    """Mimics nn.Linear init: W (out,in), b (out,) ~ U(-1/sqrt(fan_in), 1/sqrt(fan_in))."""
    dims = [INPUT_DIM, H_DIM1, H_DIM2, H_DIM3, H_DIM4, OUTPUT_DIM]
    params = []
    for i in range(len(dims) - 1):
        fan_in, fan_out = dims[i], dims[i + 1]
        key, kw, kb = jax.random.split(key, 3)
        bound = 1.0 / float(np.sqrt(fan_in))
        w = jax.random.uniform(kw, (fan_out, fan_in), jnp.float32, -bound, bound)
        b = jax.random.uniform(kb, (fan_out,), jnp.float32, -bound, bound)
        params.append((w, b))
    return params


def reference_forward(x, params):
    """Pure-JAX reference with PyTorch semantics: y = x @ W.T + b, ReLU, softmax."""
    h = x
    for i, (w, b) in enumerate(params):
        h = jnp.dot(h, w.T, precision=jax.lax.Precision.HIGHEST) + b
        if i < len(params) - 1:
            h = jnp.maximum(h, 0.0)
    return jax.nn.softmax(h, axis=-1)


if __name__ == "__main__":
    key = jax.random.PRNGKey(0)
    kparams, kx1, kx2 = jax.random.split(key, 3)

    params = init_params(kparams)
    slab = pack_params(params)

    # Small single-tile case (B=8 -> padded to one 128-wide lane tile).
    B = 8
    x = jax.random.normal(kx1, (B, INPUT_DIM), jnp.float32)
    out = network_forward(x, slab)
    jax.block_until_ready(out)
    ref = reference_forward(x, params)
    assert out.shape == (B, OUTPUT_DIM)
    # Tolerance absorbs default (bf16-pass) MXU precision on hardware.
    assert jnp.allclose(out, ref, atol=5e-3, rtol=5e-3), "mismatch vs reference (B=8)"
    # Exact normalization in the kernel => rows sum to 1 to f32 rounding.
    assert jnp.allclose(jnp.sum(out, axis=-1), 1.0, atol=1e-3), "rows must sum to ~1"

    # Multi-tile case: exercises the batch grid, pipelining and the padded tail.
    B2 = 300
    x2 = jax.random.normal(kx2, (B2, INPUT_DIM), jnp.float32)
    out2 = network_forward(x2, slab, tile_b_max=128)   # grid of 3 batch tiles
    jax.block_until_ready(out2)
    ref2 = reference_forward(x2, params)
    assert out2.shape == (B2, OUTPUT_DIM)
    assert jnp.allclose(out2, ref2, atol=5e-3, rtol=5e-3), "mismatch vs reference (B=300)"
    assert jnp.allclose(jnp.sum(out2, axis=-1), 1.0, atol=1e-3), "rows must sum to ~1"

    print("KERNEL_OK")
</pallas_src>

<mosaic_0001>
module attributes {stable_mosaic.version = 11 : i64} {
  func.func @_mlp_kernel(%arg0: i32, %arg1: memref<64x26xf32, #tpu.memory_space<vmem>>, %arg2: memref<10x128xf32, #tpu.memory_space<vmem>>, %arg3: memref<3x128xf32, #tpu.memory_space<vmem>>) attributes {dimension_semantics = [#tpu.dimension_semantics<parallel>], iteration_bounds = array<i64: 1>, scalar_prefetch = 0 : i64, scratch_operands = 0 : i64, tpu.core_type = #tpu.core_type<tc>, window_params = [{pipeline_mode = #tpu.pipeline_mode<synchronous>, transform_indices = @transform_0, window_bounds = array<i64: 64, 26>}, {transform_indices = @transform_1, window_bounds = array<i64: 10, 128>}, {transform_indices = @transform_2, window_bounds = array<i64: 3, 128>}]} {
    %c0 = arith.constant 0 : index
    %c0_0 = arith.constant 0 : index
    %0 = vector.load %arg2[%c0, %c0_0] : memref<10x128xf32, #tpu.memory_space<vmem>>, vector<10x128xf32>
    %c0_1 = arith.constant 0 : index
    %c0_2 = arith.constant 0 : index
    %1 = vector.load %arg1[%c0_1, %c0_2] : memref<64x26xf32, #tpu.memory_space<vmem>>, vector<6x10xf32>
    %c0_3 = arith.constant 0 : index
    %c10 = arith.constant 10 : index
    %2 = vector.load %arg1[%c0_3, %c10] : memref<64x26xf32, #tpu.memory_space<vmem>>, vector<6x1xf32>
    %cst = arith.constant dense<0.000000e+00> : vector<6x128xf32>
    %3 = tpu.matmul %1, %0, %cst {dimension_numbers = #tpu.dot_dimension_numbers<[1], [0], [0], [1], [0, 0, 1, 1], [], []>} : vector<6x10xf32>, vector<10x128xf32>, vector<6x128xf32> -> vector<6x128xf32>
    %4 = vector.broadcast %2 : vector<6x1xf32> to vector<6x128xf32>
    %5 = arith.addf %3, %4 : vector<6x128xf32>
    %cst_4 = arith.constant 0.000000e+00 : f32
    %6 = vector.broadcast %cst_4 : f32 to vector<6x128xf32>
    %7 = arith.maximumf %5, %6 : vector<6x128xf32>
    %c8 = arith.constant 8 : index
    %c0_5 = arith.constant 0 : index
    %8 = vector.load %arg1[%c8, %c0_5] : memref<64x26xf32, #tpu.memory_space<vmem>>, vector<25x6xf32>
    %c8_6 = arith.constant 8 : index
    %c6 = arith.constant 6 : index
    %9 = vector.load %arg1[%c8_6, %c6] : memref<64x26xf32, #tpu.memory_space<vmem>>, vector<25x1xf32>
    %cst_7 = arith.constant dense<0.000000e+00> : vector<25x128xf32>
    %10 = tpu.matmul %8, %7, %cst_7 {dimension_numbers = #tpu.dot_dimension_numbers<[1], [0], [0], [1], [0, 0, 1, 1], [], []>} : vector<25x6xf32>, vector<6x128xf32>, vector<25x128xf32> -> vector<25x128xf32>
    %11 = vector.broadcast %9 : vector<25x1xf32> to vector<25x128xf32>
    %12 = arith.addf %10, %11 : vector<25x128xf32>
    %cst_8 = arith.constant 0.000000e+00 : f32
    %13 = vector.broadcast %cst_8 : f32 to vector<25x128xf32>
    %14 = arith.maximumf %12, %13 : vector<25x128xf32>
    %c40 = arith.constant 40 : index
    %c0_9 = arith.constant 0 : index
    %15 = vector.load %arg1[%c40, %c0_9] : memref<64x26xf32, #tpu.memory_space<vmem>>, vector<8x25xf32>
    %c40_10 = arith.constant 40 : index
    %c25 = arith.constant 25 : index
    %16 = vector.load %arg1[%c40_10, %c25] : memref<64x26xf32, #tpu.memory_space<vmem>>, vector<8x1xf32>
    %cst_11 = arith.constant dense<0.000000e+00> : vector<8x128xf32>
    %17 = tpu.matmul %15, %14, %cst_11 {dimension_numbers = #tpu.dot_dimension_numbers<[1], [0], [0], [1], [0, 0, 1, 1], [], []>} : vector<8x25xf32>, vector<25x128xf32>, vector<8x128xf32> -> vector<8x128xf32>
    %18 = vector.broadcast %16 : vector<8x1xf32> to vector<8x128xf32>
    %19 = arith.addf %17, %18 : vector<8x128xf32>
    %cst_12 = arith.constant 0.000000e+00 : f32
    %20 = vector.broadcast %cst_12 : f32 to vector<8x128xf32>
    %21 = arith.maximumf %19, %20 : vector<8x128xf32>
    %c48 = arith.constant 48 : index
    %c0_13 = arith.constant 0 : index
    %22 = vector.load %arg1[%c48, %c0_13] : memref<64x26xf32, #tpu.memory_space<vmem>>, vector<6x8xf32>
    %c48_14 = arith.constant 48 : index
    %c8_15 = arith.constant 8 : index
    %23 = vector.load %arg1[%c48_14, %c8_15] : memref<64x26xf32, #tpu.memory_space<vmem>>, vector<6x1xf32>
    %cst_16 = arith.constant dense<0.000000e+00> : vector<6x128xf32>
    %24 = tpu.matmul %22, %21, %cst_16 {dimension_numbers = #tpu.dot_dimension_numbers<[1], [0], [0], [1], [0, 0, 1, 1], [], []>} : vector<6x8xf32>, vector<8x128xf32>, vector<6x128xf32> -> vector<6x128xf32>
    %25 = vector.broadcast %23 : vector<6x1xf32> to vector<6x128xf32>
    %26 = arith.addf %24, %25 : vector<6x128xf32>
    %cst_17 = arith.constant 0.000000e+00 : f32
    %27 = vector.broadcast %cst_17 : f32 to vector<6x128xf32>
    %28 = arith.maximumf %26, %27 : vector<6x128xf32>
    %c56 = arith.constant 56 : index
    %c0_18 = arith.constant 0 : index
    %29 = vector.load %arg1[%c56, %c0_18] : memref<64x26xf32, #tpu.memory_space<vmem>>, vector<3x6xf32>
    %c56_19 = arith.constant 56 : index
    %c6_20 = arith.constant 6 : index
    %30 = vector.load %arg1[%c56_19, %c6_20] : memref<64x26xf32, #tpu.memory_space<vmem>>, vector<3x1xf32>
    %cst_21 = arith.constant dense<0.000000e+00> : vector<3x128xf32>
    %31 = tpu.matmul %29, %28, %cst_21 {dimension_numbers = #tpu.dot_dimension_numbers<[1], [0], [0], [1], [0, 0, 1, 1], [], []>} : vector<3x6xf32>, vector<6x128xf32>, vector<3x128xf32> -> vector<3x128xf32>
    %32 = vector.broadcast %30 : vector<3x1xf32> to vector<3x128xf32>
    %33 = arith.addf %31, %32 : vector<3x128xf32>
    %34 = vector.extract_strided_slice %33 {offsets = [0, 0], sizes = [1, 128], strides = [1, 1]} : vector<3x128xf32> to vector<1x128xf32>
    %35 = vector.extract_strided_slice %33 {offsets = [1, 0], sizes = [1, 128], strides = [1, 1]} : vector<3x128xf32> to vector<1x128xf32>
    %36 = vector.extract_strided_slice %33 {offsets = [2, 0], sizes = [1, 128], strides = [1, 1]} : vector<3x128xf32> to vector<1x128xf32>
    %37 = arith.maximumf %34, %35 : vector<1x128xf32>
    %38 = arith.maximumf %37, %36 : vector<1x128xf32>
    %39 = arith.subf %34, %38 : vector<1x128xf32>
    %40 = math.exp %39 : vector<1x128xf32>
    %41 = arith.subf %35, %38 : vector<1x128xf32>
    %42 = math.exp %41 : vector<1x128xf32>
    %43 = arith.subf %36, %38 : vector<1x128xf32>
    %44 = math.exp %43 : vector<1x128xf32>
    %45 = arith.addf %40, %42 : vector<1x128xf32>
    %46 = arith.addf %45, %44 : vector<1x128xf32>
    %cst_22 = arith.constant 1.000000e+00 : f32
    %47 = vector.broadcast %cst_22 : f32 to vector<1x128xf32>
    %48 = arith.divf %47, %46 : vector<1x128xf32>
    %49 = arith.mulf %40, %48 : vector<1x128xf32>
    %50 = arith.mulf %42, %48 : vector<1x128xf32>
    %51 = arith.mulf %44, %48 : vector<1x128xf32>
    %52 = tpu.concatenate %49, %50, %51 in 0 : vector<1x128xf32>, vector<1x128xf32>, vector<1x128xf32> -> vector<3x128xf32>
    %c0_23 = arith.constant 0 : index
    %c0_24 = arith.constant 0 : index
    %53 = vector.load %arg3[%c0_23, %c0_24] : memref<3x128xf32, #tpu.memory_space<vmem>>, vector<3x128xf32>
    tpu.vector_store %arg3[%c0_23, %c0_24], %52 {strides = array<i32>} : memref<3x128xf32, #tpu.memory_space<vmem>>, vector<3x128xf32>,
    return
  }
  func.func @transform_0(%arg0: i32) -> (i32, i32) {
    %c0_i32 = arith.constant 0 : i32
    %c0_i32_0 = arith.constant 0 : i32
    %c0_i32_1 = arith.constant 0 : i32
    return %c0_i32, %c0_i32_0 : i32, i32
  }
  func.func @transform_1(%arg0: i32) -> (i32, i32) {
    %c0_i32 = arith.constant 0 : i32
    %c0_i32_0 = arith.constant 0 : i32
    return %c0_i32, %arg0 : i32, i32
  }
  func.func @transform_2(%arg0: i32) -> (i32, i32) {
    %c0_i32 = arith.constant 0 : i32
    %c0_i32_0 = arith.constant 0 : i32
    return %c0_i32, %arg0 : i32, i32
  }
}

</mosaic_0001>

<bundles_post_ra>
// kernel: _forward_impl.1
= control target key start
LH: loop header
LB: loop body
LE: loop exit
PB: predicated region body
PF: predicated region fallthrough
CT: control target
= control target key end

     0   :  { %vm23_vm0 = vcmask 1041408   ;;  %v649_v2 = vmov 0.0|0.0   ;;  %vm650_vm1 = vmmov 1   ;;  %vm651_vm3 = vmmov 0   ;;  %s742_s0 = inlined_call_operand.vmem [shape: f32[64,26], index: 0, kind: input, shape index: {}]   ;;  %s743_s1 = inlined_call_operand.vmem [shape: f32[10,128], index: 1, kind: input, shape index: {}]   ;;  %s744_s2 = inlined_call_operand.hbm [shape: f32[3,128], index: 2, kind: output, shape index: {}]  }
   0x1   :  { %v12_v0 = vld [vmem:[%s743_s1] sm:$0xff]  ;;  %v13_v1 = vld [vmem:[%s743_s1 + $0x8] sm:$0x3]  ;;  %590 = vmatprep.subr.bf16.mxu0 %v649_v2  ;;  %vm592_vm2 = vmpackc.low %vm23_vm0, %vm650_vm1  ;;  %v652_v4 = vmov 0.0   ;;  %vm20_vm4 = vcmask 80896   ;;  %v653_v6 = vmov 10  }
   0x2   :  { %v591_v3 = vpack.c.bf16 %v13_v1, %v12_v0  ;;  %558 = vmatprep.mubr.msk.f32.mxu0 %vm651_vm3, %v652_v4  ;;  %v14_v5 = vld [vmem:[%s742_s0] sm:$0x3f]  ;;  %610 = vset.pattern.permute.xlu0 %v653_v6 }
   0x4   :  { %593 = vmatpush3.bf16.msk.msra.mxu0 %vm592_vm2, %v591_v3 }
   0x5   :  { %7 = vsyncpa [#allocation3], 0  ;;  %17 = vperm.xlu0 %610, %v14_v5   ;;  %580 = vmatprep.subr.mxu0 %v652_v4  ;;  %v98_v7 = vld [vmem:[%s742_s0 + $0x8] sm:$0xff]  ;;  %vm122_vm5 = vcmask 48128   ;;  %v99_v8 = vld [vmem:[%s742_s0 + $0x10] sm:$0xff]  ;;  %v654_v9 = vmov 6  }
   0x6   :  { %563 = vmatprep.mubr.msk.f32.mxu1 %vm122_vm5, %v98_v7  ;;  %612 = vset.pattern.permute.xlu1 %v654_v9  ;;  %v100_v10 = vld [vmem:[%s742_s0 + $0x18] sm:$0xff]  ;;  %v101_v11 = vld [vmem:[%s742_s0 + $0x20] sm:$0x1]  ;;  %vm131_vm6 = vcmask 1045504   ;;  %v224_v17 = vld [vmem:[%s742_s0 + $0x28] sm:$0xff]  ;;  %v655_v18 = vmov 25  }
   0x7   :  { %559 = vmatmul.mubr.msk.f32.vlgmr.msra.gmra.mrb[0].mxu0 %vm20_vm4, %v14_v5  ;;  %109 = vperm.xlu1 %612, %v99_v8   ;;  %vm233_vm7 = vcmask 1040384   ;;  %vm230_vm9 = vcmask 203776   ;;  %v308_v37 = vld [vmem:[%s742_s0 + $0x30] sm:$0x3f]  ;;  %v656_v38 = vmov 8   ;;  %vm314_vm10 = vcmask 64512  }
   0x8   :  { %582 = vmatprep.mubr.msk.f32.mxu0 %vm651_vm3, %v652_v4  ;;  %vm599_vm8 = vmpackc.low %vm233_vm7, %vm650_vm1  ;;  %v388_v44 = vld [vmem:[%s742_s0 + $0x38] sm:$0x7]  ;;  %s657_s0 = smov [#allocation2]  }
   0x9   :  { %611 = vset.pattern.permute.xlu0 %v654_v9  ;;  %s517_s28 = sshll.u32 %s657_s0, 4  ;;  %s518_s28 = int_to_ptr.vmem [resolvable:$true] %s517_s28 }
   0xa   :  { %104 = vperm.xlu0 %611, %v98_v7   ;;  %s625_s29 = scalar_lea.vmem %s518_s28, 64  ;;  %p630_p1 = scmp.lt.s32.totalorder %s518_s28, %s518_s28 }
   0xb   :  { %114 = vperm.xlu1 %612, %v100_v10   ;;  %p626_p0 = scmp.ne.s32.totalorder %s518_s28, %s625_s29  ;;  %p631_p2 = scmp.lt.s32.totalorder %s625_s29, %s625_s29 }
   0xd   :  { %p632_p3 = por %p631_p2, %p630_p1 }
   0xe   :  { %613 = vset.pattern.permute.xlu0 %v655_v18 }
   0xf   :  { %119 = vperm.xlu1 %612, %v101_v11   ;;  %227 = vperm.xlu0 %613, %v224_v17   ;;  %p633_p4 = pnand %p632_p3, %p626_p0 }
  0x13   :  { %616 = vset.pattern.permute.xlu0 %v654_v9  ;;  %614 = vset.pattern.permute.xlu1 %v656_v38 }
  0x14   :  { %311 = vperm.xlu1 %614, %v308_v37  }
  0x18   :  { %615 = vset.pattern.permute.xlu1 %v654_v9 }
  0x19   :  { %391 = vperm.xlu1 %615, %v388_v44  }
  0x84   :  { %v18_v12 = vpop.permute.xlu0 %17 }
  0x86   :  { %v110_v19 = vpop.permute.xlu1 %109 }
  0x89   :  { %v105_v21 = vpop.permute.xlu0 %104 }
  0x8a   :  { %v115_v20 = vpop.permute.xlu1 %114 }
  0x8e   :  { %v120_v27 = vpop.permute.xlu1 %119  ;;  %v228_v39 = vpop.permute.xlu0 %227 }
  0x93   :  { %v312_v45 = vpop.permute.xlu1 %311 }
  0x98   :  { %v392_v50 = vpop.permute.xlu1 %391 }
  0xda   :  { %v93_v13 = vpop.f32.mrb[0].mxu0 }
  0xdb   :  { %v94_v14 = vadd.f32 %v93_v13, %v18_v12  ;;  %v560_v15 = vpop.f32.mrb[1].mxu0 }
  0xdd   :  { %v97_v16 = vmax.f32 %v94_v14, 0.0 }
  0xdf   :  { %561 = vmatprep.subr.msk.mxu1 %vm131_vm6, %v97_v16 }
  0xe0   :  { %562 = vmatpush3.msk.msra.mxu1 %vm131_vm6, %v97_v16 }
  0xe1   :  { %564 = vmatmul.mubr.msk.f32.vlgmr.msra.gmra.mrb[0].mxu1 %vm122_vm5, %v99_v8  ;;  %594 = vmatprep.subr.bf16.mxu1 %v649_v2 }
  0xe2   :  { %566 = vmatprep.mubr.msk.f32.mxu1 %vm122_vm5, %v100_v10 }
  0xe5   :  { %567 = vmatmul.mubr.msk.f32.gmra.mrb[2].mxu1 %vm122_vm5, %v101_v11 }
  0xe6   :  { %577 = vmatprep.mubr.msk.f32.mxu1 %vm651_vm3, %v652_v4 }
 0x1b4   :  { %v565_v22 = vpop.f32.mrb[0].mxu1 }
 0x1b5   :  { %v207_v23 = vadd.f32 %v565_v22, %v110_v19  ;;  %v201_v24 = vpop.f32.mrb[1].mxu1 }
 0x1b6   :  { %v202_v25 = vadd.f32 %v201_v24, %v105_v21 }
 0x1b7   :  { %v221_v26 = vmax.f32 %v207_v23, 0.0 }
 0x1b8   :  { %v220_v28 = vmax.f32 %v202_v25, 0.0  ;;  %v568_v29 = vpop.f32.mrb[2].mxu1 }
 0x1b9   :  { %v217_v30 = vadd.f32 %v568_v29, %v120_v27  ;;  %v211_v31 = vpop.f32.mrb[3].mxu1 }
 0x1ba   :  { %v595_v32 = vpack.c.bf16 %v221_v26, %v220_v28  ;;  %v212_v33 = vadd.f32 %v211_v31, %v115_v20 }
 0x1bb   :  { %v223_v34 = vmax.f32 %v217_v30, 0.0 }
 0x1bc   :  { %v222_v35 = vmax.f32 %v212_v33, 0.0  ;;  %596 = vmatpush3.bf16.msra.mxu1 %v595_v32 }
 0x1bd   :  { %597 = vmatprep.subr.bf16.mxu1 %v649_v2 }
 0x1be   :  { %v598_v36 = vpack.c.bf16 %v223_v34, %v222_v35 }
 0x1c0   :  { %600 = vmatpush3.bf16.msk.msra.mxu1 %vm599_vm8, %v598_v36 }
 0x1c3   :  { %578 = vmatmul.mubr.msk.f32.vlgmr.msra.gmra.mrb[4].mxu1 %vm230_vm9, %v224_v17 }
 0x296   :  { %v303_v40 = vpop.f32.mrb[4].mxu1 }
 0x297   :  { %v304_v41 = vadd.f32 %v303_v40, %v228_v39  ;;  %v579_v42 = vpop.f32.mrb[5].mxu1 }
 0x299   :  { %v307_v43 = vmax.f32 %v304_v41, 0.0 }
 0x29b   :  { %581 = vmatpush3.msra.mxu0 %v307_v43 }
 0x29c   :  { %583 = vmatmul.mubr.msk.f32.vlgmr.msra.gmra.mrb[2].mxu0 %vm314_vm10, %v308_v37  ;;  %585 = vmatprep.subr.mxu0 %v652_v4 }
 0x29d   :  { %587 = vmatprep.mubr.msk.f32.mxu0 %vm651_vm3, %v652_v4 }
 0x36f   :  { %v383_v46 = vpop.f32.mrb[2].mxu0 }
 0x370   :  { %v384_v47 = vadd.f32 %v383_v46, %v312_v45  ;;  %v584_v48 = vpop.f32.mrb[3].mxu0 }
 0x372   :  { %v387_v49 = vmax.f32 %v384_v47, 0.0 }
 0x374   :  { %586 = vmatpush3.msk.msra.mxu0 %vm131_vm6, %v387_v49 }
 0x375   :  { %588 = vmatmul.mubr.msk.f32.vlgmr.msra.gmra.mrb[4].mxu0 %vm122_vm5, %v388_v44 }
 0x448   :  { %v465_v51 = vpop.f32.mrb[4].mxu0 }
 0x449   :  { %v466_v52 = vadd.f32 %v465_v51, %v392_v50  ;;  %v589_v53 = vpop.f32.mrb[5].mxu0 }
 0x44b   :  { %v470_v54 = vrot.slane %v466_v52, 1  ;;  %v473_v56 = vrot.slane %v466_v52, 2 }
 0x44d   :  { %v472_v55 = vmax.f32 %v466_v52, %v470_v54 }
 0x44f   :  { %v475_v57 = vmax.f32 %v472_v55, %v473_v56 }
 0x451   :  { %v476_v58 = vsub.f32 %v466_v52, %v475_v57  ;;  %v480_v59 = vrot.slane %v475_v57, 7  ;;  %v485_v60 = vrot.slane %v475_v57, 6 }
 0x453   :  { %v482_v61 = vsub.f32 %v466_v52, %v480_v59  ;;  %v487_v62 = vsub.f32 %v466_v52, %v485_v60  ;;  %v477_v63 = vmul.f32 1.442695, %v476_v58 }
 0x455   :  { %v483_v0 = vmul.f32 1.442695, %v482_v61  ;;  %v488_v1 = vmul.f32 1.442695, %v487_v62 }
 0x457   :  { %617 = vpow2.f32 %v483_v0 }
 0x458   :  { %619 = vpow2.f32 %v488_v1 }
 0x459   :  { %621 = vpow2.f32 %v477_v63 }
 0x461   :  { %v618_v2 = vpop.eup %617 }
 0x462   :  { %v620_v3 = vpop.eup %619  ;;  %v491_v4 = vrot.slane %v618_v2, 1 }
 0x463   :  { %v622_v5 = vpop.eup %621  ;;  %v495_v7 = vrot.slane %v620_v3, 2 }
 0x464   :  { %v493_v6 = vadd.f32 %v622_v5, %v491_v4 }
 0x466   :  { %v497_v8 = vadd.f32 %v495_v7, %v493_v6 }
 0x468   :  { %623 = vrcp.f32 %v497_v8 }
 0x472   :  { %v624_v9 = vpop.eup %623 }
 0x473   :  { %v502_v10 = vrot.slane %v624_v9, 7  ;;  %v505_v11 = vrot.slane %v624_v9, 6  ;;  %v500_v12 = vmul.f32 %v624_v9, %v622_v5 }
 0x475   :  { %v504_v13 = vmul.f32 %v618_v2, %v502_v10  ;;  %v507_v14 = vmul.f32 %v620_v3, %v505_v11 }
 0x477   :  { %v508_v15 = vsel %vm233_vm7, %v500_v12, %v504_v13 }
 0x478   :  { %v509_v16 = vsel %vm23_vm0, %v508_v15, %v507_v14 }
 0x479   :  { %510 = vst [vmem:[#allocation2] sm:$0x7] %v509_v16 }
 0x47a   :  { %636 = shalt.err (!%p633_p4)
}
 0x47b   :  { %s637_s4 = scalar_lea.hbm %s744_s2, 64 }
 0x47c   :  { %p638_p5 = scmp.ne.s32.totalorder %s744_s2, %s637_s4  ;;  %p641_p6 = scmp.lt.u32.totalorder %s637_s4, %s744_s2 }
 0x47e   :  { %p643_p7 = pnand %p641_p6, %p638_p5 }
 0x480   :  { %646 = shalt.err (!%p643_p7)
}
 0x481   :  { %520 = dma.vmem_to_hbm [thread:$0]  %s518_s28, 64, %s744_s2, [#allocation3]  }
 0x482   :  { %647 = dma.done.wait [#allocation3], 64  }
 0x483   :  { %648 = vsyncadd [#allocation3], 4294967232 }
 0x484   :  { %524 = vsyncpa [#allocation3], 1 }

</bundles_post_ra>
